<compile_context>
chip_gen: v7x
topology: tpu7x:2x2x1
jax: 0.10.0
libtpu: 0.0.40
codegen_flags: <defaults>
</compile_context>

<pallas_src>
import numpy as np
import jax
import jax.numpy as jnp
from jax import lax
from jax.experimental import pallas as pl
from jax.experimental.pallas import tpu as pltpu

# (name, vocab_size, embed_dim) — mirrors the `embed_info` constructor arg.
EMBED_INFO = (("f0", 16, 8), ("f1", 32, 16), ("f2", 16, 8))
DROPOUT_P = 0.9


def _i32(x):
    """Wrap an unsigned 32-bit literal into a Python int valid for int32."""
    x &= 0xFFFFFFFF
    return x - (1 << 32) if x >= (1 << 31) else x


_C1 = _i32(0x9E3779B9)   # seed mixing constant
_C2 = _i32(0x7FEB352D)   # lowbias32 constants
_C3 = _i32(0x846CA68B)


def _make_kernel(p, fold_vocab, lane_w, tb4, n_cols, use_hw_prng):
    threshold = int(p * (1 << 24))        # keep iff low-24 random bits >= threshold
    inv_keep = float(1.0 / (1.0 - p))

    def kernel(seed_ref, idx_ref, tbl_ref, out_ref):
        idx = idx_ref[...]                                    # [tb4, n_cols] int32 (offsets pre-added)

        # ---- fused block-diagonal one-hot gather: one MXU matmul ----
        iota_v = lax.broadcasted_iota(jnp.int32, (tb4, fold_vocab), 1)
        onehot = idx[:, 0][:, None] == iota_v
        for c in range(1, n_cols):                            # disjoint vocab ranges -> OR
            onehot = jnp.logical_or(onehot, idx[:, c][:, None] == iota_v)
        emb = jnp.dot(onehot.astype(jnp.float32), tbl_ref[...],
                      preferred_element_type=jnp.float32)     # [tb4, lane_w] lane-dense

        # ---- dropout draw over the whole (lane-dense) output tile ----
        pid = pl.program_id(0)
        if use_hw_prng:
            pltpu.prng_seed(seed_ref[0], pid)
            bits = pltpu.prng_random_bits((tb4, lane_w))
            bits24 = jnp.bitwise_and(bits, jnp.array(0xFFFFFF, dtype=bits.dtype))
            keep = bits24 >= jnp.array(threshold, dtype=bits.dtype)
        else:
            # Counter-hash fallback (interpret / non-TPU). int32 counter can wrap
            # for extremely large batches; acceptable for a dropout pattern.
            row = lax.broadcasted_iota(jnp.int32, (tb4, lane_w), 0) + pid * tb4
            col = lax.broadcasted_iota(jnp.int32, (tb4, lane_w), 1)
            h = row * lane_w + col + seed_ref[0] * _C1
            h = h ^ lax.shift_right_logical(h, 16)
            h = h * _C2
            h = h ^ lax.shift_right_logical(h, 15)
            h = h * _C3
            h = h ^ lax.shift_right_logical(h, 16)
            keep = (h & 0xFFFFFF) >= threshold

        # scale folded into the select; single full-width unmasked store
        out_ref[...] = emb * jnp.where(keep, inv_keep, 0.0)

    return kernel


def embed_model_forward(x, tables, seed, p=DROPOUT_P, tile_b=None, use_hw_prng=None):
    """x: [batch, n_features] int32 indices; tables[i]: [vocab_i, dim_i] f32."""
    if use_hw_prng is None:
        use_hw_prng = jax.default_backend() == "tpu"

    batch, n_feat = x.shape
    assert n_feat == len(tables)
    vocabs = [int(t.shape[0]) for t in tables]
    dims = [int(t.shape[1]) for t in tables]
    total_vocab, total_dim = sum(vocabs), sum(dims)
    vocab_offsets = np.cumsum([0] + vocabs[:-1]).astype(np.int32)

    # Fold factor: pack `fold` batch rows into one 128-lane output row.
    fold = 128 // total_dim if (total_dim <= 128 and 128 % total_dim == 0) else 1
    lane_w = fold * total_dim
    fold_vocab = fold * total_vocab
    n_cols = fold * n_feat

    # Host-side: block-diagonal table [total_vocab, total_dim], then repeat it
    # block-diagonally `fold` times -> [fold*total_vocab, fold*total_dim].
    big = np.zeros((total_vocab, total_dim), np.float32)
    r = c = 0
    for t, v, d in zip(tables, vocabs, dims):
        big[r:r + v, c:c + d] = np.asarray(t, np.float32)
        r += v
        c += d
    big_fold = jnp.asarray(np.kron(np.eye(fold, dtype=np.float32), big))

    # ---- tile selection (large tiles: this kernel is grid-overhead bound) ----
    if tile_b is None:
        tile_b = 2048                              # ~2048 batch rows per grid step
    folded_rows = -(-batch // fold)
    want = -(-min(tile_b, batch) // fold)          # folded rows per tile (ceil)
    tb4 = max(8, ((want + 7) // 8) * 8)            # sublane multiple of 8
    # v7x megacore: keep >=2 parallel grid steps when the batch allows it.
    if folded_rows >= 16:
        half = ((-(-folded_rows // 2) + 7) // 8) * 8
        tb4 = min(tb4, max(8, half))
    n_tiles = -(-folded_rows // tb4)
    padded_folded = n_tiles * tb4
    padded = padded_folded * fold

    # ---- index preparation (all one-time XLA ops) ----
    max_idx = jnp.asarray([v - 1 for v in vocabs], jnp.int32)
    x_i = jnp.clip(x.astype(jnp.int32), 0, max_idx[None, :])
    x_off = x_i + jnp.asarray(vocab_offsets)[None, :]                 # feature offsets
    x_off = jnp.pad(x_off, ((0, padded - batch), (0, 0)))             # pad batch rows
    col_off = np.repeat(np.arange(fold, dtype=np.int32) * total_vocab, n_feat)
    x_fold = x_off.reshape(padded_folded, n_cols) + jnp.asarray(col_off)[None, :]

    seed_arr = jnp.asarray([seed], dtype=jnp.int32)

    out = pl.pallas_call(
        _make_kernel(p, fold_vocab, lane_w, tb4, n_cols, use_hw_prng),
        out_shape=jax.ShapeDtypeStruct((padded_folded, lane_w), jnp.float32),
        grid=(n_tiles,),
        in_specs=[
            pl.BlockSpec(memory_space=pltpu.MemorySpace.SMEM),          # seed scalar
            pl.BlockSpec((tb4, n_cols), lambda i: (i, 0)),              # folded index tile
            pl.BlockSpec((fold_vocab, lane_w), lambda i: (0, 0)),       # block-diag tables
        ],
        out_specs=pl.BlockSpec((tb4, lane_w), lambda i: (i, 0)),
        compiler_params=pltpu.CompilerParams(
            dimension_semantics=("parallel",),
            vmem_limit_bytes=48 * 1024 * 1024),
    )(seed_arr, x_fold, big_fold)

    # Unfold the lane-dense output slab back to [batch, total_dim] (layout only).
    return out.reshape(padded, total_dim)[:batch]


if __name__ == "__main__":
    key = jax.random.PRNGKey(0)
    batch = 16
    n_feat = len(EMBED_INFO)
    keys = jax.random.split(key, n_feat + 1)

    # Deterministic parameter init: nn.Embedding default is N(0, 1).
    tables = [jax.random.normal(keys[i], (vocab, dim), dtype=jnp.float32)
              for i, (_, vocab, dim) in enumerate(EMBED_INFO)]

    # Deterministic integer inputs, one column per embedding table.
    cols = [jax.random.randint(jax.random.fold_in(keys[-1], i),
                               (batch, 1), 0, vocab, dtype=jnp.int32)
            for i, (_, vocab, _dim) in enumerate(EMBED_INFO)]
    x = jnp.concatenate(cols, axis=1)

    out = jax.block_until_ready(embed_model_forward(x, tables, seed=1234))

    # Sanity check: wherever dropout kept a value, it must equal
    # (1/(1-p)) * concatenated-embedding reference.
    ref = jnp.concatenate([tables[i][x[:, i]] for i in range(n_feat)], axis=1)
    out_np, ref_np = np.asarray(out), np.asarray(ref)
    total_dim = sum(int(info[2]) for info in EMBED_INFO)
    assert out_np.shape == (batch, total_dim)
    mask = out_np != 0.0
    scale = 1.0 / (1.0 - DROPOUT_P)
    assert np.any(mask)                         # some values survived dropout
    assert np.mean(mask) < 0.5                  # most are dropped at p=0.9
    assert np.allclose(out_np[mask], scale * ref_np[mask], rtol=1e-5, atol=1e-5)

    print("KERNEL_OK")
</pallas_src>

<mosaic_0001>
module attributes {stable_mosaic.version = 11 : i64} {
  func.func @kernel(%arg0: i32, %arg1: memref<1xi32, #tpu.memory_space<smem>>, %arg2: memref<8x12xi32, #tpu.memory_space<vmem>>, %arg3: memref<256x128xf32, #tpu.memory_space<vmem>>, %arg4: memref<8x128xf32, #tpu.memory_space<vmem>>) attributes {dimension_semantics = [#tpu.dimension_semantics<parallel>], iteration_bounds = array<i64: 1>, scalar_prefetch = 0 : i64, scratch_operands = 0 : i64, tpu.core_type = #tpu.core_type<tc>, window_params = [{transform_indices = @transform_0, window_bounds = array<i64: 1>}, {transform_indices = @transform_1, window_bounds = array<i64: 8, 12>}, {pipeline_mode = #tpu.pipeline_mode<synchronous>, transform_indices = @transform_2, window_bounds = array<i64: 256, 128>}, {transform_indices = @transform_3, window_bounds = array<i64: 8, 128>}]} {
    %c0 = arith.constant 0 : index
    %c0_0 = arith.constant 0 : index
    %0 = vector.load %arg2[%c0, %c0_0] : memref<8x12xi32, #tpu.memory_space<vmem>>, vector<8x12xi32>
    %1 = tpu.iota {dimensions = array<i32: 1>} : vector<8x256xi32>
    %2 = vector.extract_strided_slice %0 {offsets = [0, 0], sizes = [8, 1], strides = [1, 1]} : vector<8x12xi32> to vector<8x1xi32>
    %3 = vector.shape_cast %2 : vector<8x1xi32> to vector<8xi32>
    %4 = vector.shape_cast %3 : vector<8xi32> to vector<8x1xi32>
    %5 = vector.broadcast %4 : vector<8x1xi32> to vector<8x256xi32>
    %6 = arith.cmpi eq, %5, %1 : vector<8x256xi32>
    %7 = vector.extract_strided_slice %0 {offsets = [0, 1], sizes = [8, 1], strides = [1, 1]} : vector<8x12xi32> to vector<8x1xi32>
    %8 = vector.shape_cast %7 : vector<8x1xi32> to vector<8xi32>
    %9 = vector.shape_cast %8 : vector<8xi32> to vector<8x1xi32>
    %10 = vector.broadcast %9 : vector<8x1xi32> to vector<8x256xi32>
    %11 = arith.cmpi eq, %10, %1 : vector<8x256xi32>
    %12 = arith.ori %6, %11 : vector<8x256xi1>
    %13 = vector.extract_strided_slice %0 {offsets = [0, 2], sizes = [8, 1], strides = [1, 1]} : vector<8x12xi32> to vector<8x1xi32>
    %14 = vector.shape_cast %13 : vector<8x1xi32> to vector<8xi32>
    %15 = vector.shape_cast %14 : vector<8xi32> to vector<8x1xi32>
    %16 = vector.broadcast %15 : vector<8x1xi32> to vector<8x256xi32>
    %17 = arith.cmpi eq, %16, %1 : vector<8x256xi32>
    %18 = arith.ori %12, %17 : vector<8x256xi1>
    %19 = vector.extract_strided_slice %0 {offsets = [0, 3], sizes = [8, 1], strides = [1, 1]} : vector<8x12xi32> to vector<8x1xi32>
    %20 = vector.shape_cast %19 : vector<8x1xi32> to vector<8xi32>
    %21 = vector.shape_cast %20 : vector<8xi32> to vector<8x1xi32>
    %22 = vector.broadcast %21 : vector<8x1xi32> to vector<8x256xi32>
    %23 = arith.cmpi eq, %22, %1 : vector<8x256xi32>
    %24 = arith.ori %18, %23 : vector<8x256xi1>
    %25 = vector.extract_strided_slice %0 {offsets = [0, 4], sizes = [8, 1], strides = [1, 1]} : vector<8x12xi32> to vector<8x1xi32>
    %26 = vector.shape_cast %25 : vector<8x1xi32> to vector<8xi32>
    %27 = vector.shape_cast %26 : vector<8xi32> to vector<8x1xi32>
    %28 = vector.broadcast %27 : vector<8x1xi32> to vector<8x256xi32>
    %29 = arith.cmpi eq, %28, %1 : vector<8x256xi32>
    %30 = arith.ori %24, %29 : vector<8x256xi1>
    %31 = vector.extract_strided_slice %0 {offsets = [0, 5], sizes = [8, 1], strides = [1, 1]} : vector<8x12xi32> to vector<8x1xi32>
    %32 = vector.shape_cast %31 : vector<8x1xi32> to vector<8xi32>
    %33 = vector.shape_cast %32 : vector<8xi32> to vector<8x1xi32>
    %34 = vector.broadcast %33 : vector<8x1xi32> to vector<8x256xi32>
    %35 = arith.cmpi eq, %34, %1 : vector<8x256xi32>
    %36 = arith.ori %30, %35 : vector<8x256xi1>
    %37 = vector.extract_strided_slice %0 {offsets = [0, 6], sizes = [8, 1], strides = [1, 1]} : vector<8x12xi32> to vector<8x1xi32>
    %38 = vector.shape_cast %37 : vector<8x1xi32> to vector<8xi32>
    %39 = vector.shape_cast %38 : vector<8xi32> to vector<8x1xi32>
    %40 = vector.broadcast %39 : vector<8x1xi32> to vector<8x256xi32>
    %41 = arith.cmpi eq, %40, %1 : vector<8x256xi32>
    %42 = arith.ori %36, %41 : vector<8x256xi1>
    %43 = vector.extract_strided_slice %0 {offsets = [0, 7], sizes = [8, 1], strides = [1, 1]} : vector<8x12xi32> to vector<8x1xi32>
    %44 = vector.shape_cast %43 : vector<8x1xi32> to vector<8xi32>
    %45 = vector.shape_cast %44 : vector<8xi32> to vector<8x1xi32>
    %46 = vector.broadcast %45 : vector<8x1xi32> to vector<8x256xi32>
    %47 = arith.cmpi eq, %46, %1 : vector<8x256xi32>
    %48 = arith.ori %42, %47 : vector<8x256xi1>
    %49 = vector.extract_strided_slice %0 {offsets = [0, 8], sizes = [8, 1], strides = [1, 1]} : vector<8x12xi32> to vector<8x1xi32>
    %50 = vector.shape_cast %49 : vector<8x1xi32> to vector<8xi32>
    %51 = vector.shape_cast %50 : vector<8xi32> to vector<8x1xi32>
    %52 = vector.broadcast %51 : vector<8x1xi32> to vector<8x256xi32>
    %53 = arith.cmpi eq, %52, %1 : vector<8x256xi32>
    %54 = arith.ori %48, %53 : vector<8x256xi1>
    %55 = vector.extract_strided_slice %0 {offsets = [0, 9], sizes = [8, 1], strides = [1, 1]} : vector<8x12xi32> to vector<8x1xi32>
    %56 = vector.shape_cast %55 : vector<8x1xi32> to vector<8xi32>
    %57 = vector.shape_cast %56 : vector<8xi32> to vector<8x1xi32>
    %58 = vector.broadcast %57 : vector<8x1xi32> to vector<8x256xi32>
    %59 = arith.cmpi eq, %58, %1 : vector<8x256xi32>
    %60 = arith.ori %54, %59 : vector<8x256xi1>
    %61 = vector.extract_strided_slice %0 {offsets = [0, 10], sizes = [8, 1], strides = [1, 1]} : vector<8x12xi32> to vector<8x1xi32>
    %62 = vector.shape_cast %61 : vector<8x1xi32> to vector<8xi32>
    %63 = vector.shape_cast %62 : vector<8xi32> to vector<8x1xi32>
    %64 = vector.broadcast %63 : vector<8x1xi32> to vector<8x256xi32>
    %65 = arith.cmpi eq, %64, %1 : vector<8x256xi32>
    %66 = arith.ori %60, %65 : vector<8x256xi1>
    %67 = vector.extract_strided_slice %0 {offsets = [0, 11], sizes = [8, 1], strides = [1, 1]} : vector<8x12xi32> to vector<8x1xi32>
    %68 = vector.shape_cast %67 : vector<8x1xi32> to vector<8xi32>
    %69 = vector.shape_cast %68 : vector<8xi32> to vector<8x1xi32>
    %70 = vector.broadcast %69 : vector<8x1xi32> to vector<8x256xi32>
    %71 = arith.cmpi eq, %70, %1 : vector<8x256xi32>
    %72 = arith.ori %66, %71 : vector<8x256xi1>
    %73 = arith.extui %72 : vector<8x256xi1> to vector<8x256xi32>
    %74 = arith.sitofp %73 : vector<8x256xi32> to vector<8x256xf32>
    %c0_1 = arith.constant 0 : index
    %c0_2 = arith.constant 0 : index
    %75 = vector.load %arg3[%c0_1, %c0_2] : memref<256x128xf32, #tpu.memory_space<vmem>>, vector<256x128xf32>
    %cst = arith.constant dense<0.000000e+00> : vector<8x128xf32>
    %76 = tpu.matmul %74, %75, %cst {dimension_numbers = #tpu.dot_dimension_numbers<[1], [0], [0], [1], [0, 0, 1, 1], [], []>} : vector<8x256xf32>, vector<256x128xf32>, vector<8x128xf32> -> vector<8x128xf32>
    %77 = tpu.iota {dimensions = array<i32: 0>} : vector<8x128xi32>
    %c8_i32 = arith.constant 8 : i32
    %78 = arith.muli %arg0, %c8_i32 : i32
    %79 = vector.broadcast %78 : i32 to vector<8x128xi32>
    %80 = arith.addi %77, %79 : vector<8x128xi32>
    %81 = tpu.iota {dimensions = array<i32: 1>} : vector<8x128xi32>
    %c128_i32 = arith.constant 128 : i32
    %82 = vector.broadcast %c128_i32 : i32 to vector<8x128xi32>
    %83 = arith.muli %80, %82 : vector<8x128xi32>
    %84 = arith.addi %83, %81 : vector<8x128xi32>
    %c0_3 = arith.constant 0 : index
    %85 = memref.load %arg1[%c0_3] : memref<1xi32, #tpu.memory_space<smem>>
    %c-1640531527_i32 = arith.constant -1640531527 : i32
    %86 = arith.muli %85, %c-1640531527_i32 : i32
    %87 = vector.broadcast %86 : i32 to vector<8x128xi32>
    %88 = arith.addi %84, %87 : vector<8x128xi32>
    %c16_i32 = arith.constant 16 : i32
    %89 = vector.broadcast %c16_i32 : i32 to vector<8x128xi32>
    %90 = arith.shrui %88, %89 : vector<8x128xi32>
    %91 = arith.xori %88, %90 : vector<8x128xi32>
    %c2146121005_i32 = arith.constant 2146121005 : i32
    %92 = vector.broadcast %c2146121005_i32 : i32 to vector<8x128xi32>
    %93 = arith.muli %91, %92 : vector<8x128xi32>
    %c15_i32 = arith.constant 15 : i32
    %94 = vector.broadcast %c15_i32 : i32 to vector<8x128xi32>
    %95 = arith.shrui %93, %94 : vector<8x128xi32>
    %96 = arith.xori %93, %95 : vector<8x128xi32>
    %c-2073254261_i32 = arith.constant -2073254261 : i32
    %97 = vector.broadcast %c-2073254261_i32 : i32 to vector<8x128xi32>
    %98 = arith.muli %96, %97 : vector<8x128xi32>
    %c16_i32_4 = arith.constant 16 : i32
    %99 = vector.broadcast %c16_i32_4 : i32 to vector<8x128xi32>
    %100 = arith.shrui %98, %99 : vector<8x128xi32>
    %101 = arith.xori %98, %100 : vector<8x128xi32>
    %c16777215_i32 = arith.constant 16777215 : i32
    %102 = vector.broadcast %c16777215_i32 : i32 to vector<8x128xi32>
    %103 = arith.andi %101, %102 : vector<8x128xi32>
    %c15099494_i32 = arith.constant 15099494 : i32
    %104 = vector.broadcast %c15099494_i32 : i32 to vector<8x128xi32>
    %105 = arith.cmpi sge, %103, %104 : vector<8x128xi32>
    %cst_5 = arith.constant 1.000000e+01 : f32
    %cst_6 = arith.constant 0.000000e+00 : f32
    %106 = vector.broadcast %cst_5 : f32 to vector<8x128xf32>
    %107 = vector.broadcast %cst_6 : f32 to vector<8x128xf32>
    %108 = arith.select %105, %106, %107 : vector<8x128xi1>, vector<8x128xf32>
    %109 = arith.mulf %76, %108 : vector<8x128xf32>
    %c0_7 = arith.constant 0 : index
    %c0_8 = arith.constant 0 : index
    %110 = vector.load %arg4[%c0_7, %c0_8] : memref<8x128xf32, #tpu.memory_space<vmem>>, vector<8x128xf32>
    tpu.vector_store %arg4[%c0_7, %c0_8], %109 {strides = array<i32>} : memref<8x128xf32, #tpu.memory_space<vmem>>, vector<8x128xf32>,
    return
  }
  func.func @transform_0(%arg0: i32) -> i32 {
    %c0_i32 = arith.constant 0 : i32
    %c0_i32_0 = arith.constant 0 : i32
    return %c0_i32 : i32
  }
  func.func @transform_1(%arg0: i32) -> (i32, i32) {
    %c0_i32 = arith.constant 0 : i32
    %c0_i32_0 = arith.constant 0 : i32
    return %arg0, %c0_i32 : i32, i32
  }
  func.func @transform_2(%arg0: i32) -> (i32, i32) {
    %c0_i32 = arith.constant 0 : i32
    %c0_i32_0 = arith.constant 0 : i32
    %c0_i32_1 = arith.constant 0 : i32
    return %c0_i32, %c0_i32_0 : i32, i32
  }
  func.func @transform_3(%arg0: i32) -> (i32, i32) {
    %c0_i32 = arith.constant 0 : i32
    %c0_i32_0 = arith.constant 0 : i32
    return %arg0, %c0_i32 : i32, i32
  }
}

</mosaic_0001>

<bundles_post_ra>
// kernel: tpu_custom_call.1
= control target key start
LH: loop header
LB: loop body
LE: loop exit
PB: predicated region body
PF: predicated region fallthrough
CT: control target
= control target key end

     0   :  { %9 = vsyncpa [#allocation4], 0  ;;  %s561_s0 = inlined_call_operand.<no memory space> [shape: s32[1], index: 0, kind: input, shape index: {}]   ;;  %s562_s1 = inlined_call_operand.hbm [shape: s32[8,12], index: 1, kind: input, shape index: {}]   ;;  %s563_s2 = inlined_call_operand.hbm [shape: f32[256,128], index: 2, kind: input, shape index: {}]   ;;  %s564_s3 = inlined_call_operand.hbm [shape: f32[8,128], index: 3, kind: output, shape index: {}]  }
   0x1   :  { %10 = vsyncpa [#allocation7], 0 }
   0x2   :  { %11 = vsyncpa [#allocation5], 0  ;;  %s445_s12 = smov [#allocation3]   ;;  %s446_s14 = smov [#allocation6]  }
   0x3   :  { %s20_s13 = sshll.u32 %s445_s12, 4  ;;  %s29_s15 = sshll.u32 %s446_s14, 4  ;;  %s21_s13 = int_to_ptr.vmem [resolvable:$true] %s20_s13  ;;  %s483_s15 = int_to_ptr.vmem [resolvable:$true] %s29_s15 }
   0x4   :  { %s373_s18 = scalar_lea.hbm %s562_s1, 128 }
   0x5   :  { %p374_p0 = scmp.ne.s32.totalorder %s562_s1, %s373_s18  ;;  %p377_p1 = scmp.lt.u32.totalorder %s373_s18, %s562_s1 }
   0x7   :  { %p379_p2 = pnand %p377_p1, %p374_p0 }
   0x9   :  { %382 = shalt.err (!%p379_p2)
}
   0xa   :  { %s383_s23 = scalar_lea.vmem %s21_s13, 128  ;;  %p388_p4 = scmp.lt.s32.totalorder %s21_s13, %s21_s13 }
   0xb   :  { %p384_p3 = scmp.ne.s32.totalorder %s21_s13, %s383_s23  ;;  %p389_p5 = scmp.lt.s32.totalorder %s383_s23, %s383_s23 }
   0xd   :  { %p390_p6 = por %p389_p5, %p388_p4 }
   0xf   :  { %p391_p7 = pnand %p390_p6, %p384_p3 }
  0x11   :  { %394 = shalt.err (!%p391_p7)
}
  0x12   :  { %23 = dma.hbm_to_vmem [thread:$0]  %s562_s1, 128, %s21_s13, [#allocation4]  }
  0x13   :  { %s395_s28 = scalar_lea.hbm %s563_s2, 4096 }
  0x14   :  { %p396_p8 = scmp.ne.s32.totalorder %s563_s2, %s395_s28  ;;  %p399_p9 = scmp.lt.u32.totalorder %s395_s28, %s563_s2 }
  0x16   :  { %p401_p10 = pnand %p399_p9, %p396_p8 }
  0x18   :  { %404 = shalt.err (!%p401_p10)
}
  0x19   :  { %s405_s6 = scalar_lea.vmem %s483_s15, 4096  ;;  %p410_p12 = scmp.lt.s32.totalorder %s483_s15, %s483_s15 }
  0x1a   :  { %p406_p11 = scmp.ne.s32.totalorder %s483_s15, %s405_s6  ;;  %p411_p13 = scmp.lt.s32.totalorder %s405_s6, %s405_s6 }
  0x1c   :  { %p412_p0 = por %p411_p13, %p410_p12 }
  0x1e   :  { %p413_p1 = pnand %p412_p0, %p406_p11 }
  0x20   :  { %416 = shalt.err (!%p413_p1)
}
  0x21   :  { %s447_s1 = smov 128   ;;  %s448_s7 = smov 8  }
  0x22   :  { %35 = dma.hbm_to_vmem [thread:$0]  %s563_s2, 4096, %s483_s15, [#allocation7], %s447_s1, %s447_s1, %s448_s7  }
  0x23   :  { %439 = dma.done.wait [#allocation4], 128  }
  0x24   :  { %440 = vsyncadd [#allocation4], 4294967168 }
  0x25   :  { %441 = dma.done.wait [#allocation7], 4096  }
  0x26   :  { %442 = vsyncadd [#allocation7], 4294963200  ;;  %v449_v0 = vmov 2   ;;  %v450_v1 = vmov 0   ;;  %v514_v2 = vld [vmem:[#allocation3] sm:$0xff]  ;;  %v148_v3 = vld [vmem:[#allocation6 + $0x80] sm:$0xff]  ;;  %v43_v61 = vlaneseq }
  0x27   :  { %363 = vset.pattern.permute.xlu1 %v449_v0  ;;  %361 = vset.pattern.permute.xlu0 %v450_v1  ;;  %v149_v4 = vld [vmem:[#allocation6 + $0x88] sm:$0xff]  ;;  %v132_v5 = vld [vmem:[#allocation6] sm:$0xff]  ;;  %v451_v9 = vmov 3   ;;  %v452_v10 = vmov 1   ;;  %v150_v11 = vld [vmem:[#allocation6 + $0x90] sm:$0xff]  ;;  %v453_v17 = vmov 4  }
  0x28   :  { %59 = vperm.xlu1 %363, %v514_v2   ;;  %47 = vperm.xlu0 %361, %v514_v2   ;;  %v311_v6 = vpack.c.bf16 %v149_v4, %v148_v3  ;;  %v133_v7 = vld [vmem:[#allocation6 + $0x8] sm:$0xff]  ;;  %v151_v12 = vld [vmem:[#allocation6 + $0x98] sm:$0xff]  ;;  %v134_v14 = vld [vmem:[#allocation6 + $0x10] sm:$0xff]  ;;  %v454_v18 = vmov 5   ;;  %v455_v25 = vmov 6   ;;  %v456_v26 = vmov 8  }
  0x29   :  { %v313_v8 = vpack.c.bf16 %v133_v7, %v132_v5  ;;  %v315_v13 = vpack.c.bf16 %v151_v12, %v150_v11  ;;  %v135_v15 = vld [vmem:[#allocation6 + $0x18] sm:$0xff]  ;;  %v152_v19 = vld [vmem:[#allocation6 + $0xa0] sm:$0xff]  ;;  %v153_v20 = vld [vmem:[#allocation6 + $0xa8] sm:$0xff]  ;;  %v457_v36 = vmov 7   ;;  %v458_v37 = vmov 11   ;;  %s462_s12 = smov [#allocation8]  }
  0x2a   :  { %312 = vmatprep.subr.bf16.mxu0 %v311_v6  ;;  %v317_v16 = vpack.c.bf16 %v135_v15, %v134_v14  ;;  %v319_v21 = vpack.c.bf16 %v153_v20, %v152_v19  ;;  %v136_v22 = vld [vmem:[#allocation6 + $0x20] sm:$0xff]  ;;  %v137_v23 = vld [vmem:[#allocation6 + $0x28] sm:$0xff]  ;;  %v154_v27 = vld [vmem:[#allocation6 + $0xb0] sm:$0xff]  ;;  %v459_v43 = vmov 9   ;;  %v460_v53 = vmov 10   ;;  %s264_s13 = sshll.u32 %s462_s12, 4  ;;  %s265_s13 = int_to_ptr.vmem [resolvable:$true] %s264_s13 }
  0x2b   :  { %314 = vmatpush3.bf16.msra.mxu0 %v313_v8  ;;  %v321_v24 = vpack.c.bf16 %v137_v23, %v136_v22  ;;  %v155_v28 = vld [vmem:[#allocation6 + $0xb8] sm:$0xff]  ;;  %v138_v30 = vld [vmem:[#allocation6 + $0x30] sm:$0xff]  ;;  %v156_v33 = vld [vmem:[#allocation6 + $0xc0] sm:$0xff]  ;;  %v529_v0 = vand.u32 127, %v43_v61  ;;  %v461_v12 = vmov 0.0   ;;  %v235_v15 = vshrl.u32 %v43_v61, 7  ;;  %p422_p3 = scmp.lt.s32.totalorder %s265_s13, %s265_s13 }
  0x2c   :  { %364 = vset.pattern.permute.xlu1 %v451_v9  ;;  %362 = vset.pattern.permute.xlu0 %v452_v10  ;;  %v323_v29 = vpack.c.bf16 %v155_v28, %v154_v27  ;;  %v139_v31 = vld [vmem:[#allocation6 + $0x38] sm:$0xff]  ;;  %v157_v34 = vld [vmem:[#allocation6 + $0xc8] sm:$0xff]  ;;  %v140_v38 = vld [vmem:[#allocation6 + $0x40] sm:$0xff]  ;;  %s242_s11 = smul.u32 2654435769, %s561_s0  ;;  %s417_s0 = scalar_lea.vmem %s265_s13, 128 }
  0x2d   :  { %66 = vperm.xlu1 %364, %v514_v2   ;;  %52 = vperm.xlu0 %362, %v514_v2   ;;  %v325_v32 = vpack.c.bf16 %v139_v31, %v138_v30  ;;  %v327_v35 = vpack.c.bf16 %v157_v34, %v156_v33  ;;  %v141_v39 = vld [vmem:[#allocation6 + $0x48] sm:$0xff]  ;;  %v158_v41 = vld [vmem:[#allocation6 + $0xd0] sm:$0xff]  ;;  %v159_v42 = vld [vmem:[#allocation6 + $0xd8] sm:$0xff]  ;;  %p418_p2 = scmp.ne.s32.totalorder %s265_s13, %s417_s0  ;;  %p423_p4 = scmp.lt.s32.totalorder %s417_s0, %s417_s0 }
  0x2e   :  { %316 = vmatprep.subr.bf16.mxu0 %v315_v13  ;;  %v329_v40 = vpack.c.bf16 %v141_v39, %v140_v38  ;;  %v331_v44 = vpack.c.bf16 %v159_v42, %v158_v41  ;;  %v142_v45 = vld [vmem:[#allocation6 + $0x50] sm:$0xff]  ;;  %v143_v46 = vld [vmem:[#allocation6 + $0x58] sm:$0xff]  ;;  %v160_v48 = vld [vmem:[#allocation6 + $0xe0] sm:$0xff] }
  0x2f   :  { %318 = vmatpush3.bf16.msra.mxu0 %v317_v16  ;;  %v333_v47 = vpack.c.bf16 %v143_v46, %v142_v45  ;;  %v161_v49 = vld [vmem:[#allocation6 + $0xe8] sm:$0xff]  ;;  %v144_v51 = vld [vmem:[#allocation6 + $0x60] sm:$0xff]  ;;  %v162_v55 = vld [vmem:[#allocation6 + $0xf0] sm:$0xff]  ;;  %v239_v16 = vmul.u32 128, %v235_v15  ;;  %p424_p5 = por %p423_p4, %p422_p3 }
  0x30   :  { %320 = vmatprep.subr.bf16.mxu0 %v319_v21  ;;  %v335_v50 = vpack.c.bf16 %v161_v49, %v160_v48  ;;  %v145_v52 = vld [vmem:[#allocation6 + $0x68] sm:$0xff]  ;;  %v163_v56 = vld [vmem:[#allocation6 + $0xf8] sm:$0xff]  ;;  %v146_v58 = vld [vmem:[#allocation6 + $0x70] sm:$0xff] }
  0x31   :  { %365 = vset.pattern.permute.xlu1 %v453_v17  ;;  %366 = vset.pattern.permute.xlu0 %v454_v18  ;;  %v337_v54 = vpack.c.bf16 %v145_v52, %v144_v51  ;;  %v339_v57 = vpack.c.bf16 %v163_v56, %v162_v55  ;;  %v147_v59 = vld [vmem:[#allocation6 + $0x78] sm:$0xff]  ;;  %v240_v17 = vadd.s32 %v239_v16, %v529_v0  ;;  %v243_v18 = vstv %s242_s11  ;;  %p425_p6 = pnand %p424_p5, %p418_p2 }
  0x32   :  { %73 = vperm.xlu1 %365, %v514_v2   ;;  %80 = vperm.xlu0 %366, %v514_v2   ;;  %v341_v60 = vpack.c.bf16 %v147_v59, %v146_v58 }
  0x33   :  { %322 = vmatpush3.bf16.msra.mxu0 %v321_v24  ;;  %v244_v19 = vadd.s32 %v243_v18, %v240_v17 }
  0x34   :  { %324 = vmatprep.subr.bf16.mxu0 %v323_v29 }
  0x35   :  { %v245_v20 = vshrl.u32 %v244_v19, 16 }
  0x36   :  { %367 = vset.pattern.permute.xlu1 %v455_v25  ;;  %369 = vset.pattern.permute.xlu0 %v456_v26 }
  0x37   :  { %87 = vperm.xlu1 %367, %v514_v2   ;;  %101 = vperm.xlu0 %369, %v514_v2   ;;  %v246_v21 = vxor.u32 %v245_v20, %v244_v19 }
  0x38   :  { %326 = vmatpush3.bf16.msra.mxu0 %v325_v32 }
  0x39   :  { %328 = vmatprep.subr.bf16.mxu0 %v327_v35  ;;  %v247_v22 = vmul.u32 2146121005, %v246_v21 }
  0x3b   :  { %368 = vset.pattern.permute.xlu1 %v457_v36  ;;  %372 = vset.pattern.permute.xlu0 %v458_v37  ;;  %v248_v23 = vshrl.u32 %v247_v22, 15 }
  0x3c   :  { %94 = vperm.xlu1 %368, %v514_v2   ;;  %122 = vperm.xlu0 %372, %v514_v2  }
  0x3d   :  { %330 = vmatpush3.bf16.msra.mxu0 %v329_v40  ;;  %v249_v24 = vxor.u32 %v248_v23, %v247_v22 }
  0x3e   :  { %332 = vmatprep.subr.bf16.mxu0 %v331_v44 }
  0x3f   :  { %v250_v25 = vmul.u32 2221713035, %v249_v24 }
  0x40   :  { %370 = vset.pattern.permute.xlu1 %v459_v43 }
  0x41   :  { %108 = vperm.xlu1 %370, %v514_v2   ;;  %334 = vmatpush3.bf16.msra.mxu0 %v333_v47  ;;  %v251_v26 = vshrl.u32 %v250_v25, 16 }
  0x42   :  { %336 = vmatprep.subr.bf16.mxu0 %v335_v50 }
  0x43   :  { %v252_v27 = vxor.u32 %v251_v26, %v250_v25 }
  0x45   :  { %371 = vset.pattern.permute.xlu1 %v460_v53  ;;  %338 = vmatpush3.bf16.msra.mxu0 %v337_v54  ;;  %v253_v28 = vand.u32 16777215, %v252_v27 }
  0x46   :  { %115 = vperm.xlu1 %371, %v514_v2   ;;  %340 = vmatprep.subr.bf16.mxu0 %v339_v57  ;;  %v45_v2 = vadd.s32 128, %v529_v0 }
  0x49   :  { %342 = vmatpush3.bf16.msra.mxu0 %v341_v60 }
  0xa7   :  { %v60_v62 = vpop.permute.xlu1 %59  ;;  %v48_v63 = vpop.permute.xlu0 %47 }
  0xa8   :  { %vm49_vm0 = vcmp.eq.s32.totalorder %v48_v63, %v529_v0  ;;  %vm50_vm2 = vcmp.eq.s32.totalorder %v48_v63, %v45_v2  ;;  %vm61_vm6 = vcmp.eq.s32.totalorder %v60_v62, %v529_v0  ;;  %vm62_vm7 = vcmp.eq.s32.totalorder %v60_v62, %v45_v2 }
  0xac   :  { %v67_v1 = vpop.permute.xlu1 %66  ;;  %v53_v3 = vpop.permute.xlu0 %52 }
  0xad   :  { %vm54_vm1 = vcmp.eq.s32.totalorder %v53_v3, %v529_v0  ;;  %vm55_vm3 = vcmp.eq.s32.totalorder %v53_v3, %v45_v2  ;;  %vm68_vm10 = vcmp.eq.s32.totalorder %v67_v1, %v529_v0  ;;  %vm69_vm12 = vcmp.eq.s32.totalorder %v67_v1, %v45_v2 }
  0xae   :  { %vm56_vm4 = vmor %vm49_vm0, %vm54_vm1 }
  0xaf   :  { %vm57_vm5 = vmor %vm50_vm2, %vm55_vm3 }
  0xb0   :  { %vm63_vm8 = vmor %vm56_vm4, %vm61_vm6 }
  0xb1   :  { %v74_v4 = vpop.permute.xlu1 %73  ;;  %vm64_vm9 = vmor %vm57_vm5, %vm62_vm7  ;;  %v81_v5 = vpop.permute.xlu0 %80 }
  0xb2   :  { %vm75_vm11 = vcmp.eq.s32.totalorder %v74_v4, %v529_v0  ;;  %vm70_vm13 = vmor %vm63_vm8, %vm68_vm10  ;;  %vm76_vm14 = vcmp.eq.s32.totalorder %v74_v4, %v45_v2  ;;  %vm82_vm1 = vcmp.eq.s32.totalorder %v81_v5, %v529_v0  ;;  %vm83_vm3 = vcmp.eq.s32.totalorder %v81_v5, %v45_v2 }
  0xb3   :  { %vm71_vm15 = vmor %vm64_vm9, %vm69_vm12 }
  0xb4   :  { %vm77_vm0 = vmor %vm70_vm13, %vm75_vm11 }
  0xb5   :  { %vm78_vm2 = vmor %vm71_vm15, %vm76_vm14 }
  0xb6   :  { %v88_v6 = vpop.permute.xlu1 %87  ;;  %vm84_vm6 = vmor %vm77_vm0, %vm82_vm1  ;;  %v102_v8 = vpop.permute.xlu0 %101 }
  0xb7   :  { %vm89_vm4 = vcmp.eq.s32.totalorder %v88_v6, %v529_v0  ;;  %vm90_vm5 = vcmp.eq.s32.totalorder %v88_v6, %v45_v2  ;;  %vm85_vm7 = vmor %vm78_vm2, %vm83_vm3  ;;  %vm103_vm13 = vcmp.eq.s32.totalorder %v102_v8, %v529_v0  ;;  %vm104_vm15 = vcmp.eq.s32.totalorder %v102_v8, %v45_v2 }
  0xb8   :  { %vm91_vm10 = vmor %vm84_vm6, %vm89_vm4 }
  0xb9   :  { %vm92_vm12 = vmor %vm85_vm7, %vm90_vm5 }
  0xbb   :  { %v95_v7 = vpop.permute.xlu1 %94  ;;  %v123_v10 = vpop.permute.xlu0 %122 }
  0xbc   :  { %vm96_vm8 = vcmp.eq.s32.totalorder %v95_v7, %v529_v0  ;;  %vm97_vm9 = vcmp.eq.s32.totalorder %v95_v7, %v45_v2 }
  0xbd   :  { %vm98_vm11 = vmor %vm91_vm10, %vm96_vm8  ;;  %vm124_vm8 = vcmp.eq.s32.totalorder %v123_v10, %v529_v0 }
  0xbe   :  { %vm99_vm14 = vmor %vm92_vm12, %vm97_vm9  ;;  %vm125_vm9 = vcmp.eq.s32.totalorder %v123_v10, %v45_v2 }
  0xbf   :  { %vm105_vm1 = vmor %vm98_vm11, %vm103_vm13 }
  0xc0   :  { %v109_v9 = vpop.permute.xlu1 %108  ;;  %vm106_vm3 = vmor %vm99_vm14, %vm104_vm15  ;;  %vm254_vm14 = vcmp.ge.s32.totalorder %v253_v28, 15099494 }
  0xc1   :  { %vm110_vm0 = vcmp.eq.s32.totalorder %v109_v9, %v529_v0  ;;  %vm111_vm2 = vcmp.eq.s32.totalorder %v109_v9, %v45_v2  ;;  %v255_v31 = vsel %vm254_vm14, 10.0, %v461_v12 }
  0xc2   :  { %vm112_vm4 = vmor %vm105_vm1, %vm110_vm0 }
  0xc3   :  { %vm113_vm6 = vmor %vm106_vm3, %vm111_vm2 }
  0xc5   :  { %v116_v11 = vpop.permute.xlu1 %115 }
  0xc6   :  { %vm117_vm5 = vcmp.eq.s32.totalorder %v116_v11, %v529_v0  ;;  %vm118_vm7 = vcmp.eq.s32.totalorder %v116_v11, %v45_v2 }
  0xc7   :  { %vm119_vm10 = vmor %vm112_vm4, %vm117_vm5 }
  0xc8   :  { %vm120_vm12 = vmor %vm113_vm6, %vm118_vm7 }
  0xc9   :  { %vm126_vm11 = vmor %vm119_vm10, %vm124_vm8 }
  0xca   :  { %vm127_vm13 = vmor %vm120_vm12, %vm125_vm9  ;;  %v274_v13 = vsel %vm126_vm11, 1.0, %v461_v12 }
  0xcb   :  { %v275_v14 = vsel %vm127_vm13, 1.0, %v461_v12 }
  0xcc   :  { %228 = vmatprep.mubr.f32.mxu0 %v275_v14 }
  0xcd   :  { %229 = vmatmul.mubr.f32.vlgmr.msra.gmra.mrb[0].mxu0 %v274_v13 }
 0x1a0   :  { %v308_v29 = vpop.f32.mrb[0].mxu0 }
 0x1a1   :  { %v309_v30 = vpop.f32.mrb[1].mxu0 }
 0x1a2   :  { %v310_v32 = vadd.f32 %v309_v30, %v308_v29 }
 0x1a4   :  { %v256_v33 = vmul.f32 %v310_v32, %v255_v31 }
 0x1a6   :  { %257 = vst [vmem:[#allocation8] sm:$0xff] %v256_v33 }
 0x1a7   :  { %428 = shalt.err (!%p425_p6)
}
 0x1a8   :  { %s429_s16 = scalar_lea.hbm %s564_s3, 128 }
 0x1a9   :  { %p430_p7 = scmp.ne.s32.totalorder %s564_s3, %s429_s16  ;;  %p433_p8 = scmp.lt.u32.totalorder %s429_s16, %s564_s3 }
 0x1ab   :  { %p435_p9 = pnand %p433_p8, %p430_p7 }
 0x1ad   :  { %438 = shalt.err (!%p435_p9)
}
 0x1ae   :  { %267 = dma.vmem_to_hbm [thread:$0]  %s265_s13, 128, %s564_s3, [#allocation5]  }
 0x1af   :  { %443 = dma.done.wait [#allocation5], 128  }
 0x1b0   :  { %444 = vsyncadd [#allocation5], 4294967168 }
 0x1b1   :  { %271 = vsyncpa [#allocation4], 1 }
 0x1b2   :  { %272 = vsyncpa [#allocation7], 1 }
 0x1b3   :  { %273 = vsyncpa [#allocation5], 1 }

</bundles_post_ra>
